<compile_context>
chip_gen: v7x
topology: tpu7x:2x2x1
jax: 0.10.0
libtpu: 0.0.40
codegen_flags: <defaults>
</compile_context>

<pallas_src>
import functools

import jax
import jax.numpy as jnp
from jax.experimental import pallas as pl
from jax.experimental.pallas import tpu as pltpu

_LANE = 128
_MAX_LANE_WIDTH = 8192          # cap for the lane-dense last dim
_TARGET_BLOCK_BYTES = 1 << 20   # ~1 MiB per buffer: near HBM roofline, fits VMEM


def _lambda_kernel(lambd, x_ref, o_ref):
    # Hot path: apply the user lambda to the resident VMEM tile (pure VPU/EUP).
    o_ref[...] = lambd(x_ref[...]).astype(o_ref.dtype)


def _sublane_multiple(dtype) -> int:
    # Native sublane packing: 8 rows for 32-bit, 16 for 16-bit, 32 for 8-bit.
    itemsize = jnp.dtype(dtype).itemsize
    return max(8, 32 // max(1, itemsize))


class PallasLambda:
    """Pallas equivalent of glasses' Lambda(nn.Module).

    NOTE: only *elementwise* lambdas are supported — the wrapper flattens the
    tensor into a lane-dense 2D slab, so any lambda that reduces, reshapes or
    depends on NCHW coordinates would be silently wrong. We assert the lambda
    is shape-preserving on the slab via jax.eval_shape (free, trace-time).
    """

    def __init__(self, lambd, donate_input: bool = False):
        self.lambd = lambd
        self.donate_input = donate_input

    def __call__(self, x):
        orig_shape = x.shape
        total = x.size
        itemsize = jnp.dtype(x.dtype).itemsize
        sub = _sublane_multiple(x.dtype)

        # ---- lane-dense 2D factorization; pad only if strictly necessary ----
        if total % _LANE == 0:
            pad = 0
            padded_total = total
        else:
            block_elems = sub * _LANE
            padded_total = ((total + block_elems - 1) // block_elems) * block_elems
            pad = padded_total - total

        q = padded_total // _LANE
        max_g = min(q, _MAX_LANE_WIDTH // _LANE)
        g = 1
        for cand in range(max_g, 0, -1):
            if q % cand == 0:
                g = cand
                break
        W = _LANE * g                 # wide, lane-dense last dim (multiple of 128)
        M = padded_total // W

        x_flat = x.reshape(-1)
        if pad:
            # Edge-pad so lambdas like 1/x or log(x) stay finite in the tail.
            x_flat = jnp.pad(x_flat, (0, pad), mode="edge")
        x2d = x_flat.reshape(M, W)

        # Output dtype / elementwise-shape check via abstract eval (free).
        out_aval = jax.eval_shape(self.lambd, jax.ShapeDtypeStruct(x2d.shape, x2d.dtype))
        if out_aval.shape != x2d.shape:
            raise ValueError(
                "PallasLambda only supports elementwise (shape-preserving) lambdas; "
                f"got {x2d.shape} -> {out_aval.shape}"
            )
        out_dtype = out_aval.dtype

        # ---- block sizing: ~1 MiB per buffer, dtype-aware sublane multiple ----
        rows_per_block = (_TARGET_BLOCK_BYTES // (W * itemsize)) // sub * sub
        rows_per_block = max(sub, rows_per_block)

        if rows_per_block >= M:
            # Small input: one full-extent block (exempt from the (8,128) rule).
            grid = (1,)
            block_shape = (M, W)
        else:
            grid = (pl.cdiv(M, rows_per_block),)
            block_shape = (rows_per_block, W)

        io_aliases = {}
        if self.donate_input and pad == 0 and out_dtype == x2d.dtype:
            io_aliases = {0: 0}

        out2d = pl.pallas_call(
            functools.partial(_lambda_kernel, self.lambd),
            out_shape=jax.ShapeDtypeStruct((M, W), out_dtype),
            grid_spec=pltpu.PrefetchScalarGridSpec(
                num_scalar_prefetch=0,
                grid=grid,
                in_specs=[pl.BlockSpec(block_shape, lambda i: (i, 0))],
                out_specs=pl.BlockSpec(block_shape, lambda i: (i, 0)),
            ),
            compiler_params=pltpu.CompilerParams(
                dimension_semantics=("parallel",),
            ),
            input_output_aliases=io_aliases,
        )(x2d)

        out_flat = out2d.reshape(-1)
        if pad:
            out_flat = out_flat[:total]
        return out_flat.reshape(orig_shape)


if __name__ == "__main__":
    key = jax.random.PRNGKey(0)

    # --- Demo 1: the docstring example Lambda(lambda x: x + 2) on NCHW input.
    x = jax.random.normal(key, (2, 4, 16, 16), dtype=jnp.float32)
    add_two = PallasLambda(lambda t: t + 2.0)
    y = jax.block_until_ready(add_two(x))
    ref = x + 2.0
    assert y.shape == x.shape and y.dtype == x.dtype
    assert jnp.allclose(y, ref, atol=1e-6, rtol=1e-6)

    # --- Demo 2: a larger input that exercises the tiled (multi-block) path
    #             and a transcendental lambda (EUP).
    x2 = jax.random.normal(jax.random.PRNGKey(1), (2, 4, 64, 1024), dtype=jnp.float32)
    tanh_lam = PallasLambda(lambda t: jnp.tanh(t) * 0.5)
    y2 = jax.block_until_ready(tanh_lam(x2))
    ref2 = jnp.tanh(x2) * 0.5
    assert y2.shape == x2.shape and y2.dtype == x2.dtype
    assert jnp.allclose(y2, ref2, atol=1e-5, rtol=1e-5)

    # --- Demo 3: ragged size (not a multiple of 128) exercises the edge-pad path.
    x3 = jax.random.normal(jax.random.PRNGKey(2), (3, 5, 7), dtype=jnp.float32) + 3.0
    recip_lam = PallasLambda(lambda t: 1.0 / t)
    y3 = jax.block_until_ready(recip_lam(x3))
    ref3 = 1.0 / x3
    assert y3.shape == x3.shape and y3.dtype == x3.dtype
    assert jnp.allclose(y3, ref3, atol=1e-6, rtol=1e-6)

    # TODO(synk): non-elementwise lambdas (reductions, reshapes, coordinate-
    # dependent ops) are out of scope for this flattened elementwise kernel.
    print("KERNEL_OK")
</pallas_src>

<mosaic_0001>
module attributes {stable_mosaic.version = 11 : i64} {
  func.func @_lambda_kernel(%arg0: i32, %arg1: memref<1x2048xf32, #tpu.memory_space<vmem>>, %arg2: memref<1x2048xf32, #tpu.memory_space<vmem>>) attributes {dimension_semantics = [#tpu.dimension_semantics<parallel>], iteration_bounds = array<i64: 1>, scalar_prefetch = 0 : i64, scratch_operands = 0 : i64, tpu.core_type = #tpu.core_type<tc>, window_params = [{transform_indices = @transform_0, window_bounds = array<i64: 1, 2048>}, {transform_indices = @transform_1, window_bounds = array<i64: 1, 2048>}]} {
    %c0 = arith.constant 0 : index
    %c0_0 = arith.constant 0 : index
    %0 = vector.load %arg1[%c0, %c0_0] : memref<1x2048xf32, #tpu.memory_space<vmem>>, vector<1x2048xf32>
    %cst = arith.constant 2.000000e+00 : f32
    %1 = vector.broadcast %cst : f32 to vector<1x2048xf32>
    %2 = arith.addf %0, %1 : vector<1x2048xf32>
    %c0_1 = arith.constant 0 : index
    %c0_2 = arith.constant 0 : index
    %3 = vector.load %arg2[%c0_1, %c0_2] : memref<1x2048xf32, #tpu.memory_space<vmem>>, vector<1x2048xf32>
    tpu.vector_store %arg2[%c0_1, %c0_2], %2 {strides = array<i32>} : memref<1x2048xf32, #tpu.memory_space<vmem>>, vector<1x2048xf32>,
    return
  }
  func.func @transform_0(%arg0: i32) -> (i32, i32) {
    %c0_i32 = arith.constant 0 : i32
    %c0_i32_0 = arith.constant 0 : i32
    return %arg0, %c0_i32 : i32, i32
  }
  func.func @transform_1(%arg0: i32) -> (i32, i32) {
    %c0_i32 = arith.constant 0 : i32
    %c0_i32_0 = arith.constant 0 : i32
    return %arg0, %c0_i32 : i32, i32
  }
}

</mosaic_0001>

<bundles_post_ra>
// kernel: tpu_custom_call.1
= control target key start
LH: loop header
LB: loop body
LE: loop exit
PB: predicated region body
PF: predicated region fallthrough
CT: control target
= control target key end

     0   :  { %6 = vsyncpa [#allocation3], 0  ;;  %s128_s0 = inlined_call_operand.hbm [shape: f32[1,2048], index: 0, kind: input, shape index: {}]   ;;  %s129_s1 = inlined_call_operand.hbm [shape: f32[1,2048], index: 1, kind: output, shape index: {}]  }
   0x1   :  { %7 = vsyncpa [#allocation4], 0  ;;  %s92_s6 = smov [#allocation2]   ;;  %s44_s10 = scalar_lea.hbm %s128_s0, 256 }
   0x2   :  { %s14_s7 = sshll.u32 %s92_s6, 4  ;;  %p45_p0 = scmp.ne.s32.totalorder %s128_s0, %s44_s10  ;;  %s15_s7 = int_to_ptr.vmem [resolvable:$true] %s14_s7 }
   0x3   :  { %p48_p1 = scmp.lt.u32.totalorder %s44_s10, %s128_s0 }
   0x5   :  { %p50_p2 = pnand %p48_p1, %p45_p0 }
   0x7   :  { %53 = shalt.err (!%p50_p2)
}
   0x8   :  { %s54_s15 = scalar_lea.vmem %s15_s7, 256  ;;  %p59_p4 = scmp.lt.s32.totalorder %s15_s7, %s15_s7 }
   0x9   :  { %p55_p3 = scmp.ne.s32.totalorder %s15_s7, %s54_s15  ;;  %p60_p5 = scmp.lt.s32.totalorder %s54_s15, %s54_s15 }
   0xb   :  { %p61_p6 = por %p60_p5, %p59_p4 }
   0xd   :  { %p62_p7 = pnand %p61_p6, %p55_p3 }
   0xf   :  { %65 = shalt.err (!%p62_p7)
}
  0x10   :  { %17 = dma.hbm_to_vmem [thread:$0]  %s128_s0, 256, %s15_s7, [#allocation3]  }
  0x11   :  { %88 = dma.done.wait [#allocation3], 256  }
  0x12   :  { %89 = vsyncadd [#allocation3], 4294967040  ;;  %s93_s18 = smov [#allocation5]   ;;  %v21_v0 = vld [vmem:[#allocation2] sm:$0xff]  ;;  %v22_v1 = vld [vmem:[#allocation2 + $0x8] sm:$0xff] }
  0x13   :  { %s33_s19 = sshll.u32 %s93_s18, 4  ;;  %v23_v2 = vadd.f32 2.0, %v21_v0  ;;  %v24_v3 = vadd.f32 2.0, %v22_v1  ;;  %s34_s19 = int_to_ptr.vmem [resolvable:$true] %s33_s19 }
  0x14   :  { %s66_s20 = scalar_lea.vmem %s34_s19, 256  ;;  %p71_p9 = scmp.lt.s32.totalorder %s34_s19, %s34_s19 }
  0x15   :  { %25 = vst [vmem:[#allocation5] sm:$0xff] %v23_v2  ;;  %26 = vst [vmem:[#allocation5 + $0x8] sm:$0xff] %v24_v3  ;;  %p67_p8 = scmp.ne.s32.totalorder %s34_s19, %s66_s20  ;;  %p72_p10 = scmp.lt.s32.totalorder %s66_s20, %s66_s20 }
  0x17   :  { %p73_p11 = por %p72_p10, %p71_p9 }
  0x19   :  { %p74_p12 = pnand %p73_p11, %p67_p8 }
  0x1b   :  { %77 = shalt.err (!%p74_p12)
}
  0x1c   :  { %s78_s22 = scalar_lea.hbm %s129_s1, 256 }
  0x1d   :  { %p79_p13 = scmp.ne.s32.totalorder %s129_s1, %s78_s22  ;;  %p82_p0 = scmp.lt.u32.totalorder %s78_s22, %s129_s1 }
  0x1f   :  { %p84_p1 = pnand %p82_p0, %p79_p13 }
  0x21   :  { %87 = shalt.err (!%p84_p1)
}
  0x22   :  { %36 = dma.vmem_to_hbm [thread:$0]  %s34_s19, 256, %s129_s1, [#allocation4]  }
  0x23   :  { %90 = dma.done.wait [#allocation4], 256  }
  0x24   :  { %91 = vsyncadd [#allocation4], 4294967040 }
  0x25   :  { %40 = vsyncpa [#allocation3], 1 }
  0x26   :  { %41 = vsyncpa [#allocation4], 1 }

</bundles_post_ra>
